<compile_context>
chip_gen: v6e
topology: v6e:2x2x1
jax: 0.10.0
libtpu: 0.0.40
codegen_flags: <defaults>
</compile_context>

<pallas_src>
import functools

import jax
import jax.numpy as jnp
from jax.experimental import pallas as pl
from jax.experimental.pallas import tpu as pltpu

IN_DIM = 256
HID_DIM = 128
LEAKY_SLOPE = 0.2
NEG_LARGE = -1e30  # "minus infinity" for padded logit lanes (finite f32, avoids inf-inf NaNs)


def _round_up(n, m):
    return ((n + m - 1) // m) * m


def _predictor_kernel(x_ref, w1_ref, b1_ref, w2_ref, b2_ref, out_ref, *, out_size):
    # ---- Linear(256, 128) + LeakyReLU(0.2) ----
    # x arrives as f32 straight from HBM (no extra wrapper cast pass); cast to
    # bf16 in-VMEM so the MXU runs its native bf16 path with f32 accumulation.
    x = x_ref[...].astype(jnp.bfloat16)
    h = jnp.dot(x, w1_ref[...], preferred_element_type=jnp.float32)
    h = h + b1_ref[...]
    h = jnp.maximum(h, LEAKY_SLOPE * h)  # LeakyReLU(0.2): one vmul + one vmax
    # Dropout(p=0.2): identity at inference (nn.Dropout is a no-op in eval()).
    # TODO(synk): training-mode stochastic dropout masking is not implemented.

    # ---- Linear(128, 128-lane-padded output head) ----
    h = h.astype(jnp.bfloat16)
    logits = jnp.dot(h, w2_ref[...], preferred_element_type=jnp.float32)
    logits = logits + b2_ref[...]  # padded lanes get NEG_LARGE -> exp() == 0

    # ---- Numerically stable softmax over the padded 128-lane head (f32) ----
    m = jnp.max(logits, axis=-1, keepdims=True)
    e = jnp.exp(logits - m)
    denom = jnp.sum(e, axis=-1, keepdims=True)
    probs = e / denom  # exact divide: rows sum to 1 (approx reciprocal did not)

    # Narrow writeback: only the real `out_size` columns hit HBM (64 B/row for
    # 16 classes instead of a 512 B/row padded slab + a post-kernel slice).
    out_ref[...] = probs[:, :out_size].astype(out_ref.dtype)


def prepare_params(w1, b1, w2, b2):
    """One-time parameter prep (dtype + lane-padding plumbing, hoisted out of forward).

    Shapes (already transposed vs. PyTorch's (out, in) storage):
      w1: (256, 128)   b1: (1, 128)   w2: (128, out_size)   b2: (1, out_size)
    """
    out_size = w2.shape[1]
    out_pad = _round_up(max(out_size, HID_DIM), 128)  # lane-dense head width
    w1_bf = w1.astype(jnp.bfloat16)
    b1_f32 = b1.reshape(1, HID_DIM).astype(jnp.float32)
    w2_pad = jnp.zeros((HID_DIM, out_pad), jnp.bfloat16).at[:, :out_size].set(
        w2.astype(jnp.bfloat16))
    b2_pad = jnp.full((1, out_pad), NEG_LARGE, jnp.float32).at[:, :out_size].set(
        b2.reshape(1, out_size).astype(jnp.float32))
    return w1_bf, b1_f32, w2_pad, b2_pad


@functools.partial(jax.jit, static_argnames=("out_size", "block_b"))
def predictor_forward(x, w1_bf, b1, w2_pad, b2_pad, *, out_size, block_b=4096):
    """x: (B, 256) f32; prepared params from prepare_params(); returns (B, out_size) f32."""
    B = x.shape[0]
    out_pad = w2_pad.shape[1]

    # Batch tile: big enough to amortize the ~0.35us/step pipeline overhead
    # (tb=4096 f32 rows = 4 MiB input, 8 MiB double-buffered -> fits v5e's
    # 16 MiB default scoped VMEM; raise block_b only with vmem_limit_bytes).
    # grid = cdiv(B, tb): the last block may be partial, so no wrapper-side
    # padding pass over x is needed (rows are independent; OOB rows are
    # masked on writeback).
    tb = min(block_b, _round_up(B, 8))
    grid = (pl.cdiv(B, tb),)

    kernel = functools.partial(_predictor_kernel, out_size=out_size)

    cost = pl.CostEstimate(
        flops=2 * B * (IN_DIM * HID_DIM + HID_DIM * out_pad),
        transcendentals=B * out_pad,
        bytes_accessed=(x.size * x.dtype.itemsize          # f32 x read
                        + w1_bf.size * 2 + w2_pad.size * 2  # bf16 weights
                        + b1.size * 4 + b2_pad.size * 4
                        + B * out_size * 4),                # narrow f32 output
    )

    return pl.pallas_call(
        kernel,
        out_shape=jax.ShapeDtypeStruct((B, out_size), jnp.float32),
        grid=grid,
        in_specs=[
            pl.BlockSpec((tb, IN_DIM), lambda i: (i, 0)),        # x: batch-tiled
            pl.BlockSpec((IN_DIM, HID_DIM), lambda i: (0, 0)),   # weights stay
            pl.BlockSpec((1, HID_DIM), lambda i: (0, 0)),        #   VMEM-resident
            pl.BlockSpec((HID_DIM, out_pad), lambda i: (0, 0)),
            pl.BlockSpec((1, out_pad), lambda i: (0, 0)),
        ],
        out_specs=pl.BlockSpec((tb, out_size), lambda i: (i, 0)),
        compiler_params=pltpu.CompilerParams(
            dimension_semantics=("parallel",),  # shard batch over v7x's 2 TCs
        ),
        cost_estimate=cost,
    )(x, w1_bf, b1, w2_pad, b2_pad)


def init_params(key, output_size):
    """Deterministic synthetic parameters matching the nn.Linear shapes.

    PyTorch stores Linear weight as (out, in); we keep them as (in, out) so the
    kernel avoids transposes. Init mimics uniform(-1/sqrt(in), 1/sqrt(in)).
    """
    k1, k2, k3, k4 = jax.random.split(key, 4)
    lim1 = 1.0 / jnp.sqrt(jnp.float32(IN_DIM))
    lim2 = 1.0 / jnp.sqrt(jnp.float32(HID_DIM))
    w1 = jax.random.uniform(k1, (IN_DIM, HID_DIM), jnp.float32, -lim1, lim1)
    b1 = jax.random.uniform(k2, (1, HID_DIM), jnp.float32, -lim1, lim1)
    w2 = jax.random.uniform(k3, (HID_DIM, output_size), jnp.float32, -lim2, lim2)
    b2 = jax.random.uniform(k4, (1, output_size), jnp.float32, -lim2, lim2)
    return w1, b1, w2, b2


def _reference(x, w1, b1, w2, b2):
    """Pure-JAX reference matching the kernel's bf16 rounding of x/W1/h/W2."""
    xb = x.astype(jnp.bfloat16).astype(jnp.float32)
    w1b = w1.astype(jnp.bfloat16).astype(jnp.float32)
    w2b = w2.astype(jnp.bfloat16).astype(jnp.float32)
    h = xb @ w1b + b1
    h = jnp.maximum(h, LEAKY_SLOPE * h)
    h = h.astype(jnp.bfloat16).astype(jnp.float32)
    logits = h @ w2b + b2
    return jax.nn.softmax(logits, axis=1)


if __name__ == "__main__":
    key = jax.random.PRNGKey(0)
    kx, kp = jax.random.split(key)

    OUTPUT_SIZE = 16  # number of predicted ratio classes

    w1, b1, w2, b2 = init_params(kp, OUTPUT_SIZE)
    params = prepare_params(w1, b1, w2, b2)

    # --- case 1: small batch, single grid step ---
    B = 8
    x = jax.random.normal(kx, (B, IN_DIM), jnp.float32)
    out = jax.block_until_ready(
        predictor_forward(x, *params, out_size=OUTPUT_SIZE))
    ref = _reference(x, w1, b1, w2, b2)
    assert out.shape == (B, OUTPUT_SIZE)
    assert jnp.allclose(out, ref, atol=2e-3, rtol=2e-3)
    assert jnp.allclose(jnp.sum(out, axis=1), 1.0, atol=1e-3)

    # --- case 2: exercise batch tiling + partial last block (grid of 3) ---
    B2 = 20
    x2 = jax.random.normal(jax.random.fold_in(kx, 1), (B2, IN_DIM), jnp.float32)
    out2 = jax.block_until_ready(
        predictor_forward(x2, *params, out_size=OUTPUT_SIZE, block_b=8))
    ref2 = _reference(x2, w1, b1, w2, b2)
    assert out2.shape == (B2, OUTPUT_SIZE)
    assert jnp.allclose(out2, ref2, atol=2e-3, rtol=2e-3)
    assert jnp.allclose(jnp.sum(out2, axis=1), 1.0, atol=1e-3)

    print("KERNEL_OK")
</pallas_src>

<mosaic_0001>
module attributes {stable_mosaic.version = 11 : i64} {
  func.func @_predictor_kernel(%arg0: i32, %arg1: memref<8x256xf32, #tpu.memory_space<vmem>>, %arg2: memref<256x128xbf16, #tpu.memory_space<vmem>>, %arg3: memref<1x128xf32, #tpu.memory_space<vmem>>, %arg4: memref<128x128xbf16, #tpu.memory_space<vmem>>, %arg5: memref<1x128xf32, #tpu.memory_space<vmem>>, %arg6: memref<8x16xf32, #tpu.memory_space<vmem>>) attributes {dimension_semantics = [#tpu.dimension_semantics<parallel>], iteration_bounds = array<i64: 1>, scalar_prefetch = 0 : i64, scratch_operands = 0 : i64, tpu.core_type = #tpu.core_type<tc>, window_params = [{transform_indices = @transform_0, window_bounds = array<i64: 8, 256>}, {pipeline_mode = #tpu.pipeline_mode<synchronous>, transform_indices = @transform_1, window_bounds = array<i64: 256, 128>}, {pipeline_mode = #tpu.pipeline_mode<synchronous>, transform_indices = @transform_2, window_bounds = array<i64: 1, 128>}, {pipeline_mode = #tpu.pipeline_mode<synchronous>, transform_indices = @transform_3, window_bounds = array<i64: 128, 128>}, {pipeline_mode = #tpu.pipeline_mode<synchronous>, transform_indices = @transform_4, window_bounds = array<i64: 1, 128>}, {transform_indices = @transform_5, window_bounds = array<i64: 8, 16>}]} {
    %c0 = arith.constant 0 : index
    %c0_0 = arith.constant 0 : index
    %0 = vector.load %arg1[%c0, %c0_0] : memref<8x256xf32, #tpu.memory_space<vmem>>, vector<8x256xf32>
    %1 = arith.truncf %0 : vector<8x256xf32> to vector<8x256xbf16>
    %c0_1 = arith.constant 0 : index
    %c0_2 = arith.constant 0 : index
    %2 = vector.load %arg2[%c0_1, %c0_2] : memref<256x128xbf16, #tpu.memory_space<vmem>>, vector<256x128xbf16>
    %cst = arith.constant dense<0.000000e+00> : vector<8x128xf32>
    %3 = tpu.matmul %1, %2, %cst {dimension_numbers = #tpu.dot_dimension_numbers<[1], [0], [0], [1], [0, 0, 1, 1], [], []>} : vector<8x256xbf16>, vector<256x128xbf16>, vector<8x128xf32> -> vector<8x128xf32>
    %c0_3 = arith.constant 0 : index
    %c0_4 = arith.constant 0 : index
    %4 = vector.load %arg3[%c0_3, %c0_4] : memref<1x128xf32, #tpu.memory_space<vmem>>, vector<1x128xf32>
    %5 = vector.broadcast %4 : vector<1x128xf32> to vector<8x128xf32>
    %6 = arith.addf %3, %5 : vector<8x128xf32>
    %cst_5 = arith.constant 2.000000e-01 : f32
    %7 = vector.broadcast %cst_5 : f32 to vector<8x128xf32>
    %8 = arith.mulf %7, %6 : vector<8x128xf32>
    %9 = arith.maximumf %6, %8 : vector<8x128xf32>
    %10 = arith.truncf %9 : vector<8x128xf32> to vector<8x128xbf16>
    %c0_6 = arith.constant 0 : index
    %c0_7 = arith.constant 0 : index
    %11 = vector.load %arg4[%c0_6, %c0_7] : memref<128x128xbf16, #tpu.memory_space<vmem>>, vector<128x128xbf16>
    %cst_8 = arith.constant dense<0.000000e+00> : vector<8x128xf32>
    %12 = tpu.matmul %10, %11, %cst_8 {dimension_numbers = #tpu.dot_dimension_numbers<[1], [0], [0], [1], [0, 0, 1, 1], [], []>} : vector<8x128xbf16>, vector<128x128xbf16>, vector<8x128xf32> -> vector<8x128xf32>
    %c0_9 = arith.constant 0 : index
    %c0_10 = arith.constant 0 : index
    %13 = vector.load %arg5[%c0_9, %c0_10] : memref<1x128xf32, #tpu.memory_space<vmem>>, vector<1x128xf32>
    %14 = vector.broadcast %13 : vector<1x128xf32> to vector<8x128xf32>
    %15 = arith.addf %12, %14 : vector<8x128xf32>
    %cst_11 = arith.constant dense<0xFF800000> : vector<8xf32>
    %16 = vector.multi_reduction <maximumf>, %15, %cst_11 [1] : vector<8x128xf32> to vector<8xf32>
    %17 = vector.shape_cast %16 : vector<8xf32> to vector<8x1xf32>
    %18 = vector.broadcast %17 : vector<8x1xf32> to vector<8x128xf32>
    %19 = arith.subf %15, %18 : vector<8x128xf32>
    %20 = math.exp %19 : vector<8x128xf32>
    %cst_12 = arith.constant dense<0.000000e+00> : vector<8xf32>
    %21 = vector.multi_reduction <add>, %20, %cst_12 [1] : vector<8x128xf32> to vector<8xf32>
    %22 = vector.shape_cast %21 : vector<8xf32> to vector<8x1xf32>
    %23 = vector.broadcast %22 : vector<8x1xf32> to vector<8x128xf32>
    %24 = arith.divf %20, %23 : vector<8x128xf32>
    %25 = vector.extract_strided_slice %24 {offsets = [0, 0], sizes = [8, 16], strides = [1, 1]} : vector<8x128xf32> to vector<8x16xf32>
    %c0_13 = arith.constant 0 : index
    %c0_14 = arith.constant 0 : index
    %26 = vector.load %arg6[%c0_13, %c0_14] : memref<8x16xf32, #tpu.memory_space<vmem>>, vector<8x16xf32>
    tpu.vector_store %arg6[%c0_13, %c0_14], %25 {strides = array<i32>} : memref<8x16xf32, #tpu.memory_space<vmem>>, vector<8x16xf32>,
    return
  }
  func.func @transform_0(%arg0: i32) -> (i32, i32) {
    %c0_i32 = arith.constant 0 : i32
    %c0_i32_0 = arith.constant 0 : i32
    return %arg0, %c0_i32 : i32, i32
  }
  func.func @transform_1(%arg0: i32) -> (i32, i32) {
    %c0_i32 = arith.constant 0 : i32
    %c0_i32_0 = arith.constant 0 : i32
    %c0_i32_1 = arith.constant 0 : i32
    return %c0_i32, %c0_i32_0 : i32, i32
  }
  func.func @transform_2(%arg0: i32) -> (i32, i32) {
    %c0_i32 = arith.constant 0 : i32
    %c0_i32_0 = arith.constant 0 : i32
    %c0_i32_1 = arith.constant 0 : i32
    return %c0_i32, %c0_i32_0 : i32, i32
  }
  func.func @transform_3(%arg0: i32) -> (i32, i32) {
    %c0_i32 = arith.constant 0 : i32
    %c0_i32_0 = arith.constant 0 : i32
    %c0_i32_1 = arith.constant 0 : i32
    return %c0_i32, %c0_i32_0 : i32, i32
  }
  func.func @transform_4(%arg0: i32) -> (i32, i32) {
    %c0_i32 = arith.constant 0 : i32
    %c0_i32_0 = arith.constant 0 : i32
    %c0_i32_1 = arith.constant 0 : i32
    return %c0_i32, %c0_i32_0 : i32, i32
  }
  func.func @transform_5(%arg0: i32) -> (i32, i32) {
    %c0_i32 = arith.constant 0 : i32
    %c0_i32_0 = arith.constant 0 : i32
    return %arg0, %c0_i32 : i32, i32
  }
}

</mosaic_0001>

<bundles_post_ra>
// kernel: predictor_forward.1
= control target key start
LH: loop header
LB: loop body
LE: loop exit
PB: predicated region body
PF: predicated region fallthrough
CT: control target
= control target key end

     0   :  { %10 = vsyncpa [#allocation3], 0  ;;  %s645_s0 = inlined_call_operand.hbm [shape: f32[8,256], index: 0, kind: input, shape index: {}]   ;;  %s646_s1 = inlined_call_operand.hbm [shape: bf16[256,128], index: 1, kind: input, shape index: {}]   ;;  %s647_s2 = inlined_call_operand.vmem [shape: f32[1,128], index: 2, kind: input, shape index: {}]   ;;  %s648_s3 = inlined_call_operand.hbm [shape: bf16[128,128], index: 3, kind: input, shape index: {}]   ;;  %s649_s4 = inlined_call_operand.vmem [shape: f32[1,128], index: 4, kind: input, shape index: {}]   ;;  %s650_s5 = inlined_call_operand.hbm [shape: f32[8,16], index: 5, kind: output, shape index: {}]  }
   0x1   :  { %11 = vsyncpa [#allocation6], 0 }
   0x2   :  { %12 = vsyncpa [#allocation4], 0  ;;  %s580_s18 = smov [#allocation5]  }
   0x3   :  { %s28_s19 = sshll.u32 %s580_s18, 4  ;;  %s29_s19 = int_to_ptr.vmem [resolvable:$true] %s28_s19 }
   0x4   :  { %s502_s20 = scalar_lea.vmem %s29_s19, 2048  ;;  %p507_p1 = scmp.lt.s32.totalorder %s29_s19, %s29_s19 }
   0x5   :  { %p503_p0 = scmp.ne.s32.totalorder %s29_s19, %s502_s20  ;;  %p508_p2 = scmp.lt.s32.totalorder %s502_s20, %s502_s20 }
   0x7   :  { %p509_p3 = por %p508_p2, %p507_p1 }
   0x9   :  { %p510_p4 = pnand %p509_p3, %p503_p0 }
   0xb   :  { %513 = shalt.err (!%p510_p4)
}
   0xc   :  { %s581_s21 = smov 64   ;;  %s582_s22 = smov 4  }
   0xd   :  { %34 = dma.hbm_to_vmem [thread:$0]  %s646_s1, 2048, %s29_s19, [#allocation6], %s581_s21, %s581_s21, %s582_s22  }
   0xe   :  { %s583_s25 = smov [#allocation2]   ;;  %s584_s27 = smov [#allocation7]  }
   0xf   :  { %s19_s26 = sshll.u32 %s583_s25, 4  ;;  %s42_s28 = sshll.u32 %s584_s27, 4  ;;  %s20_s26 = int_to_ptr.vmem [resolvable:$true] %s19_s26  ;;  %s43_s28 = int_to_ptr.vmem [resolvable:$true] %s42_s28 }
  0x10   :  { %s522_s29 = scalar_lea.vmem %s20_s26, 256  ;;  %p527_p6 = scmp.lt.s32.totalorder %s20_s26, %s20_s26 }
  0x11   :  { %p523_p5 = scmp.ne.s32.totalorder %s20_s26, %s522_s29  ;;  %p528_p7 = scmp.lt.s32.totalorder %s522_s29, %s522_s29 }
  0x13   :  { %p529_p8 = por %p528_p7, %p527_p6 }
  0x15   :  { %p530_p9 = pnand %p529_p8, %p523_p5 }
  0x17   :  { %533 = shalt.err (!%p530_p9)
}
  0x18   :  { %22 = dma.hbm_to_vmem [thread:$0]  %s645_s0, 256, %s20_s26, [#allocation3]  }
  0x19   :  { %s542_s7 = scalar_lea.vmem %s43_s28, 1024  ;;  %p547_p11 = scmp.lt.s32.totalorder %s43_s28, %s43_s28 }
  0x1a   :  { %p543_p10 = scmp.ne.s32.totalorder %s43_s28, %s542_s7  ;;  %p548_p12 = scmp.lt.s32.totalorder %s542_s7, %s542_s7 }
  0x1c   :  { %p549_p13 = por %p548_p12, %p547_p11 }
  0x1e   :  { %p550_p0 = pnand %p549_p13, %p543_p10 }
  0x20   :  { %553 = shalt.err (!%p550_p0)
}
  0x21   :  { %48 = dma.hbm_to_vmem [thread:$0]  %s648_s3, 1024, %s43_s28, [#allocation6], %s581_s21, %s581_s21, %s582_s22  }
  0x22   :  { %574 = dma.done.wait [#allocation3], 256  }
  0x23   :  { %575 = vsyncadd [#allocation3], 4294967040 }
  0x24   :  { %576 = dma.done.wait [#allocation6], 3072  }
  0x25   :  { %577 = vsyncadd [#allocation6], 4294964224  ;;  %v585_v0 = vmov 0.0   ;;  %v466_v1 = vld [vmem:[#allocation5 + $0x78] sm:$0xff]   ;;  %v468_v3 = vld [vmem:[#allocation5 + $0x70] sm:$0xff]   ;;  %vm586_vm0 = vmmov 0  }
  0x26   :  { %438 = vmatprep.subr.bf16.mxu1 %v585_v0  ;;  %v467_v2 = vld [vmem:[#allocation5 + $0x38] sm:$0xff]   ;;  %407 = vmatprep.subr.bf16.mxu0 %v466_v1  ;;  %v469_v4 = vld [vmem:[#allocation5 + $0x30] sm:$0xff]   ;;  %v470_v5 = vld [vmem:[#allocation5 + $0x68] sm:$0xff]   ;;  %vm363_vm1 = vcmask 130048  }
  0x27   :  { %408 = vmatpush3.bf16.msra.mxu0 %v467_v2  ;;  %v471_v6 = vld [vmem:[#allocation5 + $0x28] sm:$0xff]   ;;  %v472_v7 = vld [vmem:[#allocation5 + $0x60] sm:$0xff]   ;;  %v474_v9 = vld [vmem:[#allocation5 + $0x58] sm:$0xff]   ;;  %454 = vmatprep.mubr.msk.bf16.mxu1 %vm586_vm0, %v585_v0 }
  0x28   :  { %409 = vmatprep.subr.bf16.mxu0 %v468_v3  ;;  %v473_v8 = vld [vmem:[#allocation5 + $0x20] sm:$0xff]   ;;  %v475_v10 = vld [vmem:[#allocation5 + $0x18] sm:$0xff]   ;;  %v476_v11 = vld [vmem:[#allocation5 + $0x50] sm:$0xff]  }
  0x29   :  { %v62_v12 = vld [vmem:[#allocation2 + $0x8] sm:$0xff]  ;;  %v477_v15 = vld [vmem:[#allocation5 + $0x10] sm:$0xff]   ;;  %v478_v16 = vld [vmem:[#allocation5 + $0x48] sm:$0xff]  }
  0x2a   :  { %v64_v13 = vpack.c.bf16 %v62_v12, %v62_v12  ;;  %v482_v14 = vld [vmem:[#allocation7 + $0x38] sm:$0xff]   ;;  %v483_v17 = vld [vmem:[#allocation7 + $0x30] sm:$0xff]   ;;  %v479_v18 = vld [vmem:[#allocation5 + $0x8] sm:$0xff]  }
  0x2b   :  { %410 = vmatpush3.bf16.msra.mxu0 %v469_v4  ;;  %439 = vmatpush3.bf16.msra.mxu1 %v482_v14  ;;  %v480_v19 = vld [vmem:[#allocation5 + $0x40] sm:$0xff]   ;;  %v484_v20 = vld [vmem:[#allocation7 + $0x28] sm:$0xff]   ;;  %v61_v22 = vld [vmem:[#allocation2] sm:$0xff] }
  0x2c   :  { %411 = vmatprep.subr.bf16.mxu0 %v470_v5  ;;  %232 = vmatprep.mubr.bf16.mxu0 %v64_v13  ;;  %v481_v21 = vld [vmem:[#allocation5] sm:$0xff]   ;;  %v63_v24 = vpack.c.bf16 %v61_v22, %v61_v22  ;;  %v486_v25 = vld [vmem:[#allocation7 + $0x18] sm:$0xff]   ;;  %v487_v26 = vld [vmem:[#allocation7 + $0x10] sm:$0xff]  }
  0x2d   :  { %440 = vmatprep.subr.bf16.mxu1 %v585_v0  ;;  %v485_v23 = vld [vmem:[#allocation7 + $0x20] sm:$0xff]   ;;  %v488_v27 = vld [vmem:[#allocation7 + $0x8] sm:$0xff]   ;;  %v381_v30 = vld [vmem:[%s647_s2] ss:$0 sm:$0xff]  ;;  %s587_s2 = smov [#allocation8]  }
  0x2e   :  { %v489_v28 = vld [vmem:[#allocation7] sm:$0xff]   ;;  %v398_v39 = vld [vmem:[%s649_s4] ss:$0 sm:$0xff]  ;;  %s371_s11 = sshll.u32 %s587_s2, 4  ;;  %s372_s11 = int_to_ptr.vmem [resolvable:$true] %s371_s11 }
  0x2f   :  { %412 = vmatpush3.bf16.msra.mxu0 %v471_v6  ;;  %441 = vmatpush3.bf16.msra.mxu1 %v483_v17  ;;  %s554_s4 = scalar_lea.vmem %s372_s11, 128  ;;  %p559_p2 = scmp.lt.s32.totalorder %s372_s11, %s372_s11 }
  0x30   :  { %413 = vmatprep.subr.bf16.mxu0 %v472_v7  ;;  %442 = vmatprep.subr.bf16.mxu1 %v585_v0  ;;  %p555_p1 = scmp.ne.s32.totalorder %s372_s11, %s554_s4  ;;  %p560_p3 = scmp.lt.s32.totalorder %s554_s4, %s554_s4 }
  0x32   :  { %p561_p4 = por %p560_p3, %p559_p2 }
  0x33   :  { %414 = vmatpush3.bf16.msra.mxu0 %v473_v8  ;;  %443 = vmatpush3.bf16.msra.mxu1 %v484_v20 }
  0x34   :  { %415 = vmatprep.subr.bf16.mxu0 %v474_v9  ;;  %444 = vmatprep.subr.bf16.mxu1 %v585_v0  ;;  %p562_p5 = pnand %p561_p4, %p555_p1 }
  0x37   :  { %416 = vmatpush3.bf16.msra.mxu0 %v475_v10  ;;  %445 = vmatpush3.bf16.msra.mxu1 %v485_v23 }
  0x38   :  { %417 = vmatprep.subr.bf16.mxu0 %v476_v11  ;;  %446 = vmatprep.subr.bf16.mxu1 %v585_v0 }
  0x3b   :  { %418 = vmatpush3.bf16.msra.mxu0 %v477_v15  ;;  %447 = vmatpush3.bf16.msra.mxu1 %v486_v25 }
  0x3c   :  { %419 = vmatprep.subr.bf16.mxu0 %v478_v16  ;;  %448 = vmatprep.subr.bf16.mxu1 %v585_v0 }
  0x3f   :  { %420 = vmatpush3.bf16.msra.mxu0 %v479_v18  ;;  %449 = vmatpush3.bf16.msra.mxu1 %v487_v26 }
  0x40   :  { %421 = vmatprep.subr.bf16.mxu0 %v480_v19  ;;  %450 = vmatprep.subr.bf16.mxu1 %v585_v0 }
  0x43   :  { %422 = vmatpush3.bf16.msra.mxu0 %v481_v21  ;;  %451 = vmatpush3.bf16.msra.mxu1 %v488_v27 }
  0x44   :  { %452 = vmatprep.subr.bf16.mxu1 %v585_v0 }
  0x46   :  { %233 = vmatmul.mubr.bf16.vlgmr.msra.gmra.mxu0 %v63_v24 }
  0x47   :  { %453 = vmatpush3.bf16.msra.mxu1 %v489_v28 }
 0x106   :  { %v423_v29 = vpop.f32.mrf.mxu0 }
 0x108   :  { %v424_v31 = vpop.f32.mrf.mxu0 }
 0x109   :  { %v425_v32 = vadd.f32 %v424_v31, %v423_v29 }
 0x10a   :  { %v426_v33 = vpop.f32.mrf.mxu0 }
 0x10b   :  { %v235_v34 = vadd.f32 %v425_v32, %v381_v30 }
 0x10c   :  { %v427_v35 = vpop.f32.mrf.mxu0 }
 0x10d   :  { %v240_v36 = vmul.f32 0.2, %v235_v34 }
 0x10f   :  { %v241_v37 = vmax.f32 %v235_v34, %v240_v36 }
 0x111   :  { %v242_v38 = vpack.c.bf16 %v241_v37, %v241_v37 }
 0x113   :  { %455 = vmatmul.mubr.bf16.vlgmr.msra.gmra.mxu1 %v242_v38 }
 0x1d3   :  { %v348_v40 = vpop.f32.mrf.mxu1 }
 0x1d4   :  { %v349_v41 = vadd.f32 %v398_v39, %v348_v40 }
 0x1d5   :  { %v456_v42 = vpop.f32.mrf.mxu1 }
 0x1d6   :  { %354 = vmax.xlane.f32.xlu0 %v349_v41 }
 0x1d7   :  { %v351_v43 = vpop.f32.mrf.mxu1 }
 0x1d9   :  { %v457_v44 = vpop.f32.mrf.mxu1 }
 0x25f   :  { %v355_v45 = vpop.xlane.xlu0 %354 }
 0x260   :  { %v356_v46 = vsub.f32 %v349_v41, %v355_v45 }
 0x262   :  { %v357_v47 = vmul.f32 1.442695, %v356_v46 }
 0x264   :  { %490 = vpow2.f32 %v357_v47 }
 0x271   :  { %v491_v48 = vpop.eup %490 }
 0x272   :  { %359 = vadd.xlane.f32.xlu0 %v491_v48 }
 0x2fb   :  { %v360_v49 = vpop.xlane.xlu0 %359 }
 0x2fc   :  { %492 = vrcp.f32 %v360_v49 }
 0x309   :  { %v493_v50 = vpop.eup %492 }
 0x30a   :  { %v362_v51 = vmul.f32 %v493_v50, %v491_v48 }
 0x30c   :  { %364 = vst.msk [vmem:[#allocation8] sm:$0xff] %vm363_vm1, %v362_v51 }
 0x30d   :  { %565 = shalt.err (!%p562_p5)
}
 0x30e   :  { %374 = dma.vmem_to_hbm [thread:$0]  %s372_s11, 128, %s650_s5, [#allocation4]  }
 0x30f   :  { %578 = dma.done.wait [#allocation4], 128  }
 0x310   :  { %579 = vsyncadd [#allocation4], 4294967168 }
 0x311   :  { %378 = vsyncpa [#allocation3], 1 }
 0x312   :  { %379 = vsyncpa [#allocation6], 1 }
 0x313   :  { %380 = vsyncpa [#allocation4], 1 }

</bundles_post_ra>
